<compile_context>
chip_gen: v7x
topology: tpu7x:2x2x1
jax: 0.10.0
libtpu: 0.0.40
codegen_flags: <defaults>
</compile_context>

<pallas_src>
import jax
import jax.numpy as jnp
from jax.experimental import pallas as pl
from jax.experimental.pallas import tpu as pltpu

VOCAB = 2
DIM = 2
EPS = 1e-5
LANES = 128
MIN_TILE_ROWS = 32     # int8 ids need (32,128) tiling; also satisfies f32 (8,128)
MAX_TILE_ROWS = 4096   # 4096x128 f32 = 2 MiB per out buffer; ~5 MiB double-buffered


def _round_up(x, m):
    return -(-x // m) * m


def dummy_model_kernel(ids_ref, tbl_ref, out_ref):
    # ids_ref: (tile_rows, 128) int8 — token id duplicated per output element.
    # tbl_ref: (8, 128) f32 — row 0/1 hold the folded network output for token
    #          id 0/1 with the output column already baked into lane parity.
    # out_ref: (tile_rows, 128) f32 — lane-dense flattened logits.
    ids = ids_ref[...].astype(jnp.int32)        # unpack int8 -> 32-bit lanes
    row0 = tbl_ref[0:1, :]                      # (1, 128): id-0 pattern
    row1 = tbl_ref[1:2, :]                      # (1, 128): id-1 pattern
    out_ref[...] = jnp.where(ids == 0, row0, row1)   # 1 cmp + 1 select / vreg


# ----------------------------- model math (O(1)) -----------------------------
def _linear(x, w, b):
    return jnp.dot(x, w, precision=jax.lax.Precision.HIGHEST) + b


def _layernorm(x, g, b):
    m = jnp.mean(x, axis=-1, keepdims=True)
    v = jnp.mean((x - m) ** 2, axis=-1, keepdims=True)   # biased var, like torch
    return (x - m) / jnp.sqrt(v + EPS) * g + b


def _fold_table(params):
    """(VOCAB, DIM) table: the full network applied to every possible token id."""
    h = params["emb"]                                     # rows are ids 0..VOCAB-1
    h = _linear(h, params["w1"], params["b1"])
    h = _layernorm(h, params["g1"], params["be1"])
    h = _linear(h, params["w2"], params["b2"])
    h = _layernorm(h, params["g2"], params["be2"])
    return _linear(h, params["wh"], params["bh"])


def make_params(key):
    """Deterministic init (shapes match the PyTorch module).

    nn.Linear weight (out, in) is stored transposed as (in, out) so the math is
    x @ W + b.  LayerNorm gamma/beta are perturbed away from 1/0 so the affine
    path is exercised.
    """
    keys = jax.random.split(key, 11)
    return {
        "emb": jax.random.normal(keys[0], (VOCAB, DIM), jnp.float32),
        "w1": jax.random.normal(keys[1], (DIM, DIM), jnp.float32) * 0.5,
        "b1": jax.random.normal(keys[2], (1, DIM), jnp.float32) * 0.1,
        "g1": 1.0 + jax.random.normal(keys[3], (1, DIM), jnp.float32) * 0.1,
        "be1": jax.random.normal(keys[4], (1, DIM), jnp.float32) * 0.1,
        "w2": jax.random.normal(keys[5], (DIM, DIM), jnp.float32) * 0.5,
        "b2": jax.random.normal(keys[6], (1, DIM), jnp.float32) * 0.1,
        "g2": 1.0 + jax.random.normal(keys[7], (1, DIM), jnp.float32) * 0.1,
        "be2": jax.random.normal(keys[8], (1, DIM), jnp.float32) * 0.1,
        "wh": jax.random.normal(keys[9], (DIM, DIM), jnp.float32) * 0.5,
        "bh": jax.random.normal(keys[10], (1, DIM), jnp.float32) * 0.1,
    }


# --------------------------------- forward -----------------------------------
@jax.jit
def dummy_model_forward(x_ids, params):
    """x_ids: (B, S) int32 in [0, VOCAB). Returns (B, S, DIM) float32."""
    B, S = x_ids.shape
    N = B * S
    F = N * DIM                                   # flattened output elements

    # O(1) wrapper-side fold: build the two lane-patterned select rows.
    table = _fold_table(params)                                   # (VOCAB, DIM)
    col = jnp.arange(LANES, dtype=jnp.int32) % DIM                # lane parity
    rows = jnp.where(col[None, :] == 0, table[:, 0:1], table[:, 1:2])  # (2,128)
    tbl = jnp.zeros((8, LANES), jnp.float32).at[:VOCAB, :].set(rows)

    # Tile sizing: balanced tiles (no wasted tail tile), 32-row aligned,
    # >=2 grid steps when there is enough work (v7x megacore split).
    rows_needed = -(-F // LANES)
    if rows_needed >= 8 * MIN_TILE_ROWS:
        min_tiles = 4
    elif rows_needed >= 2 * MIN_TILE_ROWS:
        min_tiles = 2
    else:
        min_tiles = 1
    num_tiles = max(-(-rows_needed // MAX_TILE_ROWS), min_tiles)
    tile_rows = min(MAX_TILE_ROWS,
                    _round_up(-(-rows_needed // num_tiles), MIN_TILE_ROWS))
    num_tiles = -(-rows_needed // tile_rows)
    total_rows = num_tiles * tile_rows

    # int8 per-output-element token-id stream (2 bytes/token instead of 8).
    ids = jnp.broadcast_to(x_ids.reshape(N, 1), (N, DIM)).reshape(F)
    ids = ids.astype(jnp.int8)
    pad = total_rows * LANES - F
    if pad:
        ids = jnp.pad(ids, (0, pad))              # padded lanes -> id 0, sliced off
    ids = ids.reshape(total_rows, LANES)

    out = pl.pallas_call(
        dummy_model_kernel,
        out_shape=jax.ShapeDtypeStruct((total_rows, LANES), jnp.float32),
        grid_spec=pltpu.PrefetchScalarGridSpec(
            num_scalar_prefetch=0,
            grid=(num_tiles,),
            in_specs=[
                pl.BlockSpec((tile_rows, LANES), lambda i: (i, 0)),
                pl.BlockSpec((8, LANES), lambda i: (0, 0)),   # constant -> DMA'd once
            ],
            out_specs=pl.BlockSpec((tile_rows, LANES), lambda i: (i, 0)),
        ),
        compiler_params=pltpu.CompilerParams(
            dimension_semantics=("parallel",)),   # independent row tiles
    )(ids, tbl)

    if pad:
        return out.reshape(-1)[:F].reshape(B, S, DIM)
    return out.reshape(B, S, DIM)                 # free bitcast when F % 128 == 0


# ------------------------------- reference -----------------------------------
def reference_forward(x_ids, params):
    """Pure-JAX reference matching the PyTorch forward semantics."""
    h = params["emb"][x_ids]                      # embedding gather: (B, S, DIM)
    h = _linear(h, params["w1"], params["b1"])
    h = _layernorm(h, params["g1"], params["be1"])
    h = _linear(h, params["w2"], params["b2"])
    h = _layernorm(h, params["g2"], params["be2"])
    return _linear(h, params["wh"], params["bh"])


if __name__ == "__main__":
    key = jax.random.PRNGKey(0)
    pkey, xkey = jax.random.split(key)
    params = make_params(pkey)

    B, S = 2, 8
    # Token ids must be valid indices into the embedding (nn.Embedding contract).
    x_ids = jax.random.randint(xkey, (B, S), 0, VOCAB, dtype=jnp.int32)

    logits = dummy_model_forward(x_ids, params)
    logits = jax.block_until_ready(logits)

    ref = reference_forward(x_ids, params)
    assert logits.shape == (B, S, DIM)
    assert jnp.allclose(logits, ref, atol=1e-5, rtol=1e-5), "mismatch vs reference"

    print("KERNEL_OK")
</pallas_src>

<mosaic_0001>
module attributes {stable_mosaic.version = 11 : i64} {
  func.func @dummy_model_kernel(%arg0: i32, %arg1: memref<32x128xi8, #tpu.memory_space<vmem>>, %arg2: memref<8x128xf32, #tpu.memory_space<vmem>>, %arg3: memref<32x128xf32, #tpu.memory_space<vmem>>) attributes {dimension_semantics = [#tpu.dimension_semantics<parallel>], iteration_bounds = array<i64: 1>, scalar_prefetch = 0 : i64, scratch_operands = 0 : i64, tpu.core_type = #tpu.core_type<tc>, window_params = [{transform_indices = @transform_0, window_bounds = array<i64: 32, 128>}, {pipeline_mode = #tpu.pipeline_mode<synchronous>, transform_indices = @transform_1, window_bounds = array<i64: 8, 128>}, {transform_indices = @transform_2, window_bounds = array<i64: 32, 128>}]} {
    %c0 = arith.constant 0 : index
    %c0_0 = arith.constant 0 : index
    %0 = vector.load %arg1[%c0, %c0_0] : memref<32x128xi8, #tpu.memory_space<vmem>>, vector<32x128xi8>
    %1 = arith.extsi %0 : vector<32x128xi8> to vector<32x128xi32>
    %c0_1 = arith.constant 0 : index
    %c0_2 = arith.constant 0 : index
    %2 = vector.load %arg2[%c0_1, %c0_2] : memref<8x128xf32, #tpu.memory_space<vmem>>, vector<1x128xf32>
    %c1 = arith.constant 1 : index
    %c0_3 = arith.constant 0 : index
    %3 = vector.load %arg2[%c1, %c0_3] : memref<8x128xf32, #tpu.memory_space<vmem>>, vector<1x128xf32>
    %c0_i32 = arith.constant 0 : i32
    %4 = vector.broadcast %c0_i32 : i32 to vector<32x128xi32>
    %5 = arith.cmpi eq, %1, %4 : vector<32x128xi32>
    %6 = vector.shape_cast %2 : vector<1x128xf32> to vector<1x128xf32>
    %7 = vector.broadcast %6 : vector<1x128xf32> to vector<32x128xf32>
    %8 = vector.shape_cast %3 : vector<1x128xf32> to vector<1x128xf32>
    %9 = vector.broadcast %8 : vector<1x128xf32> to vector<32x128xf32>
    %10 = arith.select %5, %7, %9 : vector<32x128xi1>, vector<32x128xf32>
    %c0_4 = arith.constant 0 : index
    %c0_5 = arith.constant 0 : index
    %11 = vector.load %arg3[%c0_4, %c0_5] : memref<32x128xf32, #tpu.memory_space<vmem>>, vector<32x128xf32>
    tpu.vector_store %arg3[%c0_4, %c0_5], %10 {strides = array<i32>} : memref<32x128xf32, #tpu.memory_space<vmem>>, vector<32x128xf32>,
    return
  }
  func.func @transform_0(%arg0: i32) -> (i32, i32) {
    %c0_i32 = arith.constant 0 : i32
    %c0_i32_0 = arith.constant 0 : i32
    return %arg0, %c0_i32 : i32, i32
  }
  func.func @transform_1(%arg0: i32) -> (i32, i32) {
    %c0_i32 = arith.constant 0 : i32
    %c0_i32_0 = arith.constant 0 : i32
    %c0_i32_1 = arith.constant 0 : i32
    return %c0_i32, %c0_i32_0 : i32, i32
  }
  func.func @transform_2(%arg0: i32) -> (i32, i32) {
    %c0_i32 = arith.constant 0 : i32
    %c0_i32_0 = arith.constant 0 : i32
    return %arg0, %c0_i32 : i32, i32
  }
}

</mosaic_0001>

<bundles_post_ra>
// kernel: dummy_model_forward.1
= control target key start
LH: loop header
LB: loop body
LE: loop exit
PB: predicated region body
PF: predicated region fallthrough
CT: control target
= control target key end

     0   :  { %s80_s0 = inlined_call_operand.vmem [shape: s8[32,128], index: 0, kind: input, shape index: {}]   ;;  %s81_s1 = inlined_call_operand.vmem [shape: f32[8,128], index: 1, kind: input, shape index: {}]   ;;  %s82_s2 = inlined_call_operand.vmem [shape: f32[32,128], index: 2, kind: output, shape index: {}]  }
   0x1   :  { %v11_v0 = vld [vmem:[%s80_s0] sm:$0xff] }
   0x2   :  { %v12_v1 = vunpack.c.0.s8 %v11_v0  ;;  %v42_v2 = vld [vmem:[%s81_s1] ss:$0 sm:$0xff]  ;;  %v43_v3 = vld [vmem:[%s81_s1 + $0x1] ss:$0 sm:$0xff]  ;;  %v13_v4 = vunpack.c.1.s8 %v11_v0  ;;  %v14_v5 = vunpack.c.2.s8 %v11_v0  ;;  %v15_v6 = vunpack.c.3.s8 %v11_v0 }
   0x4   :  { %vm18_vm0 = vcmp.eq.s32.totalorder %v12_v1, 0  ;;  %vm19_vm1 = vcmp.eq.s32.totalorder %v13_v4, 0  ;;  %vm20_vm2 = vcmp.eq.s32.totalorder %v14_v5, 0  ;;  %vm21_vm3 = vcmp.eq.s32.totalorder %v15_v6, 0 }
   0x5   :  { %v30_v7 = vsel %vm18_vm0, %v42_v2, %v43_v3  ;;  %v31_v8 = vsel %vm19_vm1, %v42_v2, %v43_v3  ;;  %v32_v9 = vsel %vm20_vm2, %v42_v2, %v43_v3  ;;  %v33_v10 = vsel %vm21_vm3, %v42_v2, %v43_v3 }
   0x6   :  { %34 = vst [vmem:[%s82_s2] sm:$0xff] %v30_v7  ;;  %35 = vst [vmem:[%s82_s2 + $0x8] sm:$0xff] %v31_v8 }
   0x7   :  { %36 = vst [vmem:[%s82_s2 + $0x10] sm:$0xff] %v32_v9  ;;  %37 = vst [vmem:[%s82_s2 + $0x18] sm:$0xff] %v33_v10 }

</bundles_post_ra>
